<compile_context>
chip_gen: v6e
topology: v6e:2x2x1
jax: 0.10.0
libtpu: 0.0.40
codegen_flags: <defaults>
</compile_context>

<pallas_src>
import functools

import jax
import jax.numpy as jnp
from jax.experimental import pallas as pl
from jax.experimental.pallas import tpu as pltpu


def _round_up(n, m):
    return ((n + m - 1) // m) * m


def _linear_kernel(x_ref, w_ref, b_ref, o_ref):
    """Single reduction step: full feature dim resident in VMEM."""
    # x_ref: (tb, D) VMEM, w_ref: (1, D) VMEM, b_ref: (1, 1) SMEM, o_ref: (tb, 1) VMEM
    prod = x_ref[...].astype(jnp.float32) * w_ref[...].astype(jnp.float32)  # VPU broadcast
    acc = jnp.sum(prod, axis=-1, keepdims=True)                             # XLU lane reduce
    o_ref[...] = (acc + b_ref[0, 0]).astype(o_ref.dtype)


def _linear_kernel_dtiled(x_ref, w_ref, b_ref, o_ref, acc_ref, *, d_total, mask_cols):
    """Feature-tiled reduction: accumulate partial dot products across the k grid axis."""
    k = pl.program_id(1)

    @pl.when(k == 0)
    def _init():
        acc_ref[...] = jnp.zeros_like(acc_ref)

    prod = x_ref[...].astype(jnp.float32) * w_ref[...].astype(jnp.float32)
    if mask_cols:
        # Last feature tile reads past D; zero the padded columns (robust to NaN garbage).
        td = prod.shape[-1]
        col = k * td + jax.lax.broadcasted_iota(jnp.int32, prod.shape, 1)
        prod = jnp.where(col < d_total, prod, 0.0)
    acc_ref[...] += jnp.sum(prod, axis=-1, keepdims=True)

    @pl.when(k == pl.num_programs(1) - 1)
    def _finalize():
        o_ref[...] = (acc_ref[...] + b_ref[0, 0]).astype(o_ref.dtype)


def _choose_tiles(batch, input_dim, itemsize, *, x_tile_budget_bytes=8 * 1024 * 1024,
                  max_rows=8192, block_rows=None, block_cols=None):
    """Byte-based tile sizing.

    * Feature (reduction) tile `td`: full input_dim unless even a 256-row tile would
      blow the budget, in which case the feature axis is tiled in 128-lane multiples
      and reduced across a second ("arbitrary") grid axis.
    * Row tile `tb`: fills the x-tile byte budget (accounting for 128-lane padding of
      VMEM tiles when input_dim < 128), capped at `max_rows` (bounds the lane-padded
      (tb, 1) output/accumulator blocks) and at the (padded) batch.
    """
    max_cols = max(128, ((x_tile_budget_bytes // (256 * itemsize)) // 128) * 128)
    if block_cols is not None and block_cols < input_dim:
        td = max(128, (min(block_cols, max_cols) // 128) * 128)
    elif input_dim <= max_cols:
        td = input_dim
    else:
        td = max_cols

    lane_padded_row_bytes = _round_up(td, 128) * itemsize
    rows_fit = max(8, x_tile_budget_bytes // lane_padded_row_bytes)
    tb = block_rows if block_rows is not None else min(rows_fit, max_rows)
    tb = min(tb, _round_up(batch, 8))   # never tile coarser than the (padded) batch
    tb = max(8, (tb // 8) * 8)
    return tb, td


def logistic_regression_forward_pallas(x, weight, bias, *, block_rows=None, block_cols=None,
                                       core_parallel=False):
    """Pallas path. x: (B, D); weight: (1, D) [torch nn.Linear layout]; bias: (1,)."""
    B, D = x.shape
    itemsize = jnp.dtype(x.dtype).itemsize
    tb, td = _choose_tiles(B, D, itemsize, block_rows=block_rows, block_cols=block_cols)
    ni = pl.cdiv(B, tb)
    nk = pl.cdiv(D, td)

    b2d = bias.reshape(1, 1).astype(jnp.float32)
    cost = pl.CostEstimate(
        flops=2 * B * D,
        transcendentals=0,
        bytes_accessed=(B * D + D + B + 1) * itemsize,
    )

    # On v7x, core_parallel=True splits the batch-tile loop across the 2 TensorCores.
    row_sem = pltpu.CORE_PARALLEL if core_parallel else pltpu.PARALLEL

    if nk == 1:
        kernel = _linear_kernel
        grid = (ni,)
        in_specs = [
            pl.BlockSpec((tb, D), lambda i: (i, 0)),     # batch-tiled x, pipelined
            pl.BlockSpec((1, D), lambda i: (0, 0)),      # weight row resident in VMEM
            pl.BlockSpec(memory_space=pltpu.SMEM),       # bias scalar in SMEM
        ]
        out_specs = pl.BlockSpec((tb, 1), lambda i: (i, 0))
        scratch_shapes = []
        dims = (row_sem,)
    else:
        kernel = functools.partial(_linear_kernel_dtiled, d_total=D, mask_cols=(D % td != 0))
        grid = (ni, nk)                                   # reduction axis last
        in_specs = [
            pl.BlockSpec((tb, td), lambda i, k: (i, k)),
            pl.BlockSpec((1, td), lambda i, k: (0, k)),
            pl.BlockSpec(memory_space=pltpu.SMEM),
        ]
        out_specs = pl.BlockSpec((tb, 1), lambda i, k: (i, 0))   # resident across k
        scratch_shapes = [pltpu.VMEM((tb, 1), jnp.float32)]
        dims = (row_sem, pltpu.ARBITRARY)

    return pl.pallas_call(
        kernel,
        out_shape=jax.ShapeDtypeStruct((B, 1), x.dtype),
        grid_spec=pltpu.PrefetchScalarGridSpec(
            num_scalar_prefetch=0,
            grid=grid,
            in_specs=in_specs,
            out_specs=out_specs,
            scratch_shapes=scratch_shapes,
        ),
        compiler_params=pltpu.CompilerParams(
            dimension_semantics=dims,
            # 2x8 MiB x tiles + (tb,1) out/acc blocks + a possibly materialised product
            # temp stay well inside 40 MiB; fits v5e/v6e (128 MiB) and v7x (64 MiB) VMEM.
            vmem_limit_bytes=40 * 1024 * 1024,
        ),
        cost_estimate=cost,
    )(x, weight, b2d)


_PALLAS_MIN_BYTES = 4 * 1024 * 1024


def logistic_regression_forward(x, weight, bias):
    """Dispatcher: sub-4MiB activations are pure launch overhead for Pallas; let XLA fuse them."""
    if x.shape[0] * x.shape[1] * jnp.dtype(x.dtype).itemsize < _PALLAS_MIN_BYTES:
        return x @ weight.T + bias.reshape(1, 1)
    return logistic_regression_forward_pallas(x, weight, bias)


if __name__ == "__main__":
    key = jax.random.PRNGKey(0)
    kx, kw, kb, kx2, kw2 = jax.random.split(key, 5)

    # Config 1: small feature dim, matching nn.Linear(input_dim, 1).
    batch, input_dim = 256, 32
    x = jax.random.normal(kx, (batch, input_dim), dtype=jnp.float32)
    bound = 1.0 / (input_dim ** 0.5)
    weight = jax.random.uniform(kw, (1, input_dim), jnp.float32, -bound, bound)
    bias = jax.random.uniform(kb, (1,), jnp.float32, -bound, bound)
    y_ref = x @ weight.T + bias

    # Forced 128-row tiles -> 2 pipelined grid steps over the batch.
    y = logistic_regression_forward_pallas(x, weight, bias, block_rows=128)
    jax.block_until_ready(y)
    assert y.shape == (batch, 1)
    assert jnp.allclose(y, y_ref, atol=1e-5, rtol=1e-5)

    # Auto (byte-based) tiling: single step at this size.
    y2 = logistic_regression_forward_pallas(x, weight, bias)
    jax.block_until_ready(y2)
    assert jnp.allclose(y2, y_ref, atol=1e-5, rtol=1e-5)

    # Config 2: feature-tiled reduction path (D not a multiple of the column tile ->
    # exercises the k grid axis, the VMEM accumulator and the ragged-column mask).
    batch2, input_dim2 = 128, 320
    x2 = jax.random.normal(kx2, (batch2, input_dim2), dtype=jnp.float32)
    bound2 = 1.0 / (input_dim2 ** 0.5)
    weight2 = jax.random.uniform(kw2, (1, input_dim2), jnp.float32, -bound2, bound2)
    y2_ref = x2 @ weight2.T + bias
    y3 = logistic_regression_forward_pallas(x2, weight2, bias, block_cols=128)
    jax.block_until_ready(y3)
    assert y3.shape == (batch2, 1)
    assert jnp.allclose(y3, y2_ref, atol=1e-4, rtol=1e-5)

    # Byte-based dispatcher: tiny problems stay on plain XLA (no Pallas launch overhead).
    y4 = logistic_regression_forward(x[:8], weight, bias)
    jax.block_until_ready(y4)
    assert jnp.allclose(y4, x[:8] @ weight.T + bias, atol=1e-5, rtol=1e-5)

    print("KERNEL_OK")
</pallas_src>

<mosaic_0001>
module attributes {stable_mosaic.version = 11 : i64} {
  func.func @_linear_kernel(%arg0: i32, %arg1: memref<128x32xf32, #tpu.memory_space<vmem>>, %arg2: memref<1x32xf32, #tpu.memory_space<vmem>>, %arg3: memref<1x1xf32, #tpu.memory_space<smem>>, %arg4: memref<128x1xf32, #tpu.memory_space<vmem>>) attributes {dimension_semantics = [#tpu.dimension_semantics<parallel>], iteration_bounds = array<i64: 2>, scalar_prefetch = 0 : i64, scratch_operands = 0 : i64, tpu.core_type = #tpu.core_type<tc>, window_params = [{transform_indices = @transform_0, window_bounds = array<i64: 128, 32>}, {pipeline_mode = #tpu.pipeline_mode<synchronous>, transform_indices = @transform_1, window_bounds = array<i64: 1, 32>}, {transform_indices = @transform_2, window_bounds = array<i64: 1, 1>}, {transform_indices = @transform_3, window_bounds = array<i64: 128, 1>}]} {
    %c0 = arith.constant 0 : index
    %c0_0 = arith.constant 0 : index
    %0 = vector.load %arg1[%c0, %c0_0] : memref<128x32xf32, #tpu.memory_space<vmem>>, vector<128x32xf32>
    %c0_1 = arith.constant 0 : index
    %c0_2 = arith.constant 0 : index
    %1 = vector.load %arg2[%c0_1, %c0_2] : memref<1x32xf32, #tpu.memory_space<vmem>>, vector<1x32xf32>
    %2 = vector.broadcast %1 : vector<1x32xf32> to vector<128x32xf32>
    %3 = arith.mulf %0, %2 : vector<128x32xf32>
    %cst = arith.constant dense<0.000000e+00> : vector<128xf32>
    %4 = vector.multi_reduction <add>, %3, %cst [1] : vector<128x32xf32> to vector<128xf32>
    %5 = vector.shape_cast %4 : vector<128xf32> to vector<128x1xf32>
    %c0_3 = arith.constant 0 : index
    %c0_4 = arith.constant 0 : index
    %6 = memref.load %arg3[%c0_3, %c0_4] : memref<1x1xf32, #tpu.memory_space<smem>>
    %7 = vector.broadcast %6 : f32 to vector<128x1xf32>
    %8 = arith.addf %5, %7 : vector<128x1xf32>
    %c0_5 = arith.constant 0 : index
    %c0_6 = arith.constant 0 : index
    %9 = vector.load %arg4[%c0_5, %c0_6] : memref<128x1xf32, #tpu.memory_space<vmem>>, vector<128x1xf32>
    tpu.vector_store %arg4[%c0_5, %c0_6], %8 {strides = array<i32>} : memref<128x1xf32, #tpu.memory_space<vmem>>, vector<128x1xf32>,
    return
  }
  func.func @transform_0(%arg0: i32) -> (i32, i32) {
    %c0_i32 = arith.constant 0 : i32
    %c0_i32_0 = arith.constant 0 : i32
    return %arg0, %c0_i32 : i32, i32
  }
  func.func @transform_1(%arg0: i32) -> (i32, i32) {
    %c0_i32 = arith.constant 0 : i32
    %c0_i32_0 = arith.constant 0 : i32
    %c0_i32_1 = arith.constant 0 : i32
    return %c0_i32, %c0_i32_0 : i32, i32
  }
  func.func @transform_2(%arg0: i32) -> (i32, i32) {
    %c0_i32 = arith.constant 0 : i32
    %c0_i32_0 = arith.constant 0 : i32
    %c0_i32_1 = arith.constant 0 : i32
    return %c0_i32, %c0_i32_0 : i32, i32
  }
  func.func @transform_3(%arg0: i32) -> (i32, i32) {
    %c0_i32 = arith.constant 0 : i32
    %c0_i32_0 = arith.constant 0 : i32
    return %arg0, %c0_i32 : i32, i32
  }
}

</mosaic_0001>

<bundles_post_ra>
// kernel: tpu_custom_call.1
= control target key start
LH: loop header
LB: loop body
LE: loop exit
PB: predicated region body
PF: predicated region fallthrough
CT: control target
= control target key end

     0   :  { %s405_s14 = smov 0   ;;  %s500_s0 = inlined_call_operand.vmem [shape: f32[256,32], index: 0, kind: input, shape index: {}]   ;;  %s501_s1 = inlined_call_operand.vmem [shape: f32[1,32], index: 1, kind: input, shape index: {}]   ;;  %s502_s2 = inlined_call_operand.<no memory space> [shape: f32[1,1], index: 2, kind: input, shape index: {}]   ;;  %s503_s3 = inlined_call_operand.vmem [shape: f32[256,1], index: 3, kind: output, shape index: {}]  }
   0x1   :  { %8 = sst [smem:[#allocation2]] %s502_s2 }
   0x2 LB: > { %s354_s15 = sadd.s32 4294967295, %s380_s14   ;;  %p358_p0 = scmp.ge.s32.totalorder %s380_s14, 1  ;;  %s380_s14 = sphi %s405_s14, %s14_s14  }
   0x3   : > { %p139_p1 = scmp.lt.s32.totalorder %s380_s14, 3 }
   0x5   : > { %p140_p2 = pnand %p358_p0, %p139_p1 }
   0x6   : > { %s359_s16 = sshll.u32 (!%p140_p2), %s354_s15, 4  ;;  %s263_s22 = sld [smem:[#allocation2]] (!%p140_p2) }
   0x7   : > { %143 = sbr.rel (%p140_p2) target bundleno = 188 (0xbc), region = 32  ;;  %p164_p3 = scmp.lt.s32.totalorder (!%p140_p2), %s359_s16, 31 }
   0xc   : > { %s505_s16 = smov (!%p164_p3, %s359_s16), 31  ;;  %v363_v0 = vld [vmem:[%s501_s1] ss:$0 sm:$0xff]  ;;  %vm214_vm0 = vcmask 261120   ;;  %v264_v49 = vstv %s263_s22  ;;  %vm281_vm1 = vcmask 7168  }
   0xd   : > { %s360_s2 = sshll.u32 %s505_s16, 3 }
   0xe   : > { %s424_s21 = scalar_lea.vmem %s500_s0, %s360_s2  ;;  %s463_s25 = scalar_lea.vmem %s503_s3, %s360_s2 }
   0xf   : > { %v177_v1 = vld [vmem:[%s424_s21 + $0x10] sm:$0xff]  ;;  %v175_v2 = vld [vmem:[%s424_s21] sm:$0xff]  ;;  %v178_v3 = vld [vmem:[%s424_s21 + $0x18] sm:$0xff] }
  0x10   : > { %v200_v4 = vmul.f32 %v363_v0, %v177_v1  ;;  %v198_v5 = vmul.f32 %v363_v0, %v175_v2  ;;  %v201_v6 = vmul.f32 %v363_v0, %v178_v3  ;;  %v176_v7 = vld [vmem:[%s424_s21 + $0x8] sm:$0xff]  ;;  %v179_v10 = vld [vmem:[%s424_s21 + $0x20] sm:$0xff]  ;;  %v182_v17 = vld [vmem:[%s424_s21 + $0x38] sm:$0xff] }
  0x11   : > { %v199_v8 = vmul.f32 %v363_v0, %v176_v7  ;;  %v180_v9 = vld [vmem:[%s424_s21 + $0x28] sm:$0xff]  ;;  %v202_v16 = vmul.f32 %v363_v0, %v179_v10  ;;  %v181_v18 = vld [vmem:[%s424_s21 + $0x30] sm:$0xff]  ;;  %v205_v21 = vmul.f32 %v363_v0, %v182_v17  ;;  %v183_v24 = vld [vmem:[%s424_s21 + $0x40] sm:$0xff] }
  0x12   : > { %v221_v11 = vsel %vm214_vm0, %v200_v4, 0.0  ;;  %v215_v12 = vsel %vm214_vm0, %v198_v5, 0.0  ;;  %v224_v13 = vsel %vm214_vm0, %v201_v6, 0.0  ;;  %v203_v15 = vmul.f32 %v363_v0, %v180_v9  ;;  %v184_v23 = vld [vmem:[%s424_s21 + $0x48] sm:$0xff]  ;;  %v186_v29 = vld [vmem:[%s424_s21 + $0x58] sm:$0xff]  ;;  %v185_v30 = vld [vmem:[%s424_s21 + $0x50] sm:$0xff] }
  0x13   : > { %222 = vadd.xlane.f32.xlu1 %v221_v11  ;;  %216 = vadd.xlane.f32.xlu0 %v215_v12  ;;  %v218_v14 = vsel %vm214_vm0, %v199_v8, 0.0  ;;  %v227_v20 = vsel %vm214_vm0, %v202_v16, 0.0  ;;  %v204_v22 = vmul.f32 %v363_v0, %v181_v18  ;;  %v236_v25 = vsel %vm214_vm0, %v205_v21, 0.0  ;;  %v188_v35 = vld [vmem:[%s424_s21 + $0x68] sm:$0xff]  ;;  %v187_v36 = vld [vmem:[%s424_s21 + $0x60] sm:$0xff]  ;;  %v190_v41 = vld [vmem:[%s424_s21 + $0x78] sm:$0xff] }
  0x14   : > { %v230_v19 = vsel %vm214_vm0, %v203_v15, 0.0  ;;  %v207_v27 = vmul.f32 %v363_v0, %v184_v23  ;;  %v206_v28 = vmul.f32 %v363_v0, %v183_v24  ;;  %v209_v33 = vmul.f32 %v363_v0, %v186_v29  ;;  %v189_v42 = vld [vmem:[%s424_s21 + $0x70] sm:$0xff] }
  0x15   : > { %v233_v26 = vsel %vm214_vm0, %v204_v22, 0.0  ;;  %v208_v34 = vmul.f32 %v363_v0, %v185_v30  ;;  %v211_v39 = vmul.f32 %v363_v0, %v188_v35  ;;  %v210_v40 = vmul.f32 %v363_v0, %v187_v36 }
  0x16   : > { %v242_v31 = vsel %vm214_vm0, %v207_v27, 0.0  ;;  %v239_v32 = vsel %vm214_vm0, %v206_v28, 0.0  ;;  %v248_v37 = vsel %vm214_vm0, %v209_v33, 0.0  ;;  %v213_v45 = vmul.f32 %v363_v0, %v190_v41 }
  0x17   : > { %225 = vadd.xlane.f32.xlu1 %v224_v13  ;;  %219 = vadd.xlane.f32.xlu0 %v218_v14  ;;  %v245_v38 = vsel %vm214_vm0, %v208_v34, 0.0  ;;  %v254_v43 = vsel %vm214_vm0, %v211_v39, 0.0  ;;  %v251_v44 = vsel %vm214_vm0, %v210_v40, 0.0  ;;  %v212_v46 = vmul.f32 %v363_v0, %v189_v42 }
  0x18   : > { %v260_v47 = vsel %vm214_vm0, %v213_v45, 0.0 }
  0x19   : > { %v257_v48 = vsel %vm214_vm0, %v212_v46, 0.0 }
  0x1b   : > { %231 = vadd.xlane.f32.xlu1 %v230_v19  ;;  %228 = vadd.xlane.f32.xlu0 %v227_v20 }
  0x1f   : > { %237 = vadd.xlane.f32.xlu1 %v236_v25  ;;  %234 = vadd.xlane.f32.xlu0 %v233_v26 }
  0x23   : > { %243 = vadd.xlane.f32.xlu1 %v242_v31  ;;  %240 = vadd.xlane.f32.xlu0 %v239_v32 }
  0x27   : > { %249 = vadd.xlane.f32.xlu1 %v248_v37  ;;  %246 = vadd.xlane.f32.xlu0 %v245_v38 }
  0x2b   : > { %255 = vadd.xlane.f32.xlu1 %v254_v43  ;;  %252 = vadd.xlane.f32.xlu0 %v251_v44 }
  0x2f   : > { %261 = vadd.xlane.f32.xlu1 %v260_v47  ;;  %258 = vadd.xlane.f32.xlu0 %v257_v48 }
  0x9c   : > { %v223_v50 = vpop.xlane.xlu1 %222  ;;  %v217_v51 = vpop.xlane.xlu0 %216 }
  0x9d   : > { %v267_v52 = vadd.f32 %v264_v49, %v223_v50  ;;  %v265_v53 = vadd.f32 %v264_v49, %v217_v51 }
  0x9f   : > { %284 = vst.msk [vmem:[%s463_s25 + $0x10] sm:$0xff] %vm281_vm1, %v267_v52  ;;  %282 = vst.msk [vmem:[%s463_s25] sm:$0xff] %vm281_vm1, %v265_v53 }
  0xa0   : > { %v226_v54 = vpop.xlane.xlu1 %225  ;;  %v220_v55 = vpop.xlane.xlu0 %219 }
  0xa1   : > { %v268_v56 = vadd.f32 %v264_v49, %v226_v54  ;;  %v266_v57 = vadd.f32 %v264_v49, %v220_v55 }
  0xa3   : > { %285 = vst.msk [vmem:[%s463_s25 + $0x18] sm:$0xff] %vm281_vm1, %v268_v56  ;;  %283 = vst.msk [vmem:[%s463_s25 + $0x8] sm:$0xff] %vm281_vm1, %v266_v57 }
  0xa4   : > { %v232_v58 = vpop.xlane.xlu1 %231  ;;  %v229_v59 = vpop.xlane.xlu0 %228 }
  0xa5   : > { %v270_v60 = vadd.f32 %v264_v49, %v232_v58  ;;  %v269_v61 = vadd.f32 %v264_v49, %v229_v59 }
  0xa7   : > { %287 = vst.msk [vmem:[%s463_s25 + $0x28] sm:$0xff] %vm281_vm1, %v270_v60  ;;  %286 = vst.msk [vmem:[%s463_s25 + $0x20] sm:$0xff] %vm281_vm1, %v269_v61 }
  0xa8   : > { %v238_v62 = vpop.xlane.xlu1 %237  ;;  %v235_v63 = vpop.xlane.xlu0 %234 }
  0xa9   : > { %v272_v0 = vadd.f32 %v264_v49, %v238_v62  ;;  %v271_v1 = vadd.f32 %v264_v49, %v235_v63 }
  0xab   : > { %289 = vst.msk [vmem:[%s463_s25 + $0x38] sm:$0xff] %vm281_vm1, %v272_v0  ;;  %288 = vst.msk [vmem:[%s463_s25 + $0x30] sm:$0xff] %vm281_vm1, %v271_v1 }
  0xac   : > { %v244_v2 = vpop.xlane.xlu1 %243  ;;  %v241_v3 = vpop.xlane.xlu0 %240 }
  0xad   : > { %v274_v4 = vadd.f32 %v264_v49, %v244_v2  ;;  %v273_v5 = vadd.f32 %v264_v49, %v241_v3 }
  0xaf   : > { %291 = vst.msk [vmem:[%s463_s25 + $0x48] sm:$0xff] %vm281_vm1, %v274_v4  ;;  %290 = vst.msk [vmem:[%s463_s25 + $0x40] sm:$0xff] %vm281_vm1, %v273_v5 }
  0xb0   : > { %v250_v6 = vpop.xlane.xlu1 %249  ;;  %v247_v7 = vpop.xlane.xlu0 %246 }
  0xb1   : > { %v276_v8 = vadd.f32 %v264_v49, %v250_v6  ;;  %v275_v9 = vadd.f32 %v264_v49, %v247_v7 }
  0xb3   : > { %293 = vst.msk [vmem:[%s463_s25 + $0x58] sm:$0xff] %vm281_vm1, %v276_v8  ;;  %292 = vst.msk [vmem:[%s463_s25 + $0x50] sm:$0xff] %vm281_vm1, %v275_v9 }
  0xb4   : > { %v256_v10 = vpop.xlane.xlu1 %255  ;;  %v253_v11 = vpop.xlane.xlu0 %252 }
  0xb5   : > { %v278_v12 = vadd.f32 %v264_v49, %v256_v10  ;;  %v277_v13 = vadd.f32 %v264_v49, %v253_v11 }
  0xb7   : > { %295 = vst.msk [vmem:[%s463_s25 + $0x68] sm:$0xff] %vm281_vm1, %v278_v12  ;;  %294 = vst.msk [vmem:[%s463_s25 + $0x60] sm:$0xff] %vm281_vm1, %v277_v13 }
  0xb8   : > { %v262_v14 = vpop.xlane.xlu1 %261  ;;  %v259_v15 = vpop.xlane.xlu0 %258 }
  0xb9   : > { %v280_v16 = vadd.f32 %v264_v49, %v262_v14  ;;  %v279_v17 = vadd.f32 %v264_v49, %v259_v15 }
  0xbb   : > { %297 = vst.msk [vmem:[%s463_s25 + $0x78] sm:$0xff] %vm281_vm1, %v280_v16  ;;  %296 = vst.msk [vmem:[%s463_s25 + $0x70] sm:$0xff] %vm281_vm1, %v279_v17 }
  0xbc PF: > { %s14_s14 = sadd.s32 1, %s380_s14  }
  0xbd   : > { %p11_p4 = scmp.ge.s32.totalorder %s14_s14, 4  }
  0xbf   :  { %13 = sbr.rel (!%p11_p4) target bundleno = 2 (0x2), region = 62 }

</bundles_post_ra>
